<compile_context>
chip_gen: v5e
topology: v5e:2x2
jax: 0.10.0
libtpu: 0.0.40
codegen_flags: <defaults>
</compile_context>

<pallas_src>
import jax
import jax.numpy as jnp
from jax import lax
from jax.experimental import pallas as pl
from jax.experimental.pallas import tpu as pltpu


C_PAD = 128  # lane-dense class dimension


def logreg_kernel(x_ref, w_ref, b_ref, o_ref):
    # bf16 x/W on the MXU, f32 accumulation; f32 bias add.
    # Padded bias columns are -1e30 -> their exp underflows to exactly 0, so
    # they never affect the row max or the softmax denominator.
    logits = jnp.dot(
        x_ref[...], w_ref[...], preferred_element_type=jnp.float32
    ) + b_ref[...]                                         # (TB, 128) f32

    # log-softmax == log(exp(l)/sum(exp(l))) rewritten stably.
    m = jnp.max(logits, axis=1, keepdims=True)             # (TB, 1)  XLU
    s = jnp.sum(jnp.exp(logits - m), axis=1, keepdims=True)
    o_ref[...] = logits - (m + jnp.log(s))                 # full-width store


def _round_up(n, m):
    return (n + m - 1) // m * m


def logreg_forward(x_nchw, w, b, *, tb=2048, slice_output=True):
    """x_nchw: (B, 1, 28, 28); w: (D, C); b: (C,).

    Returns (B, C) log-probs (or the raw (B, 128) lane-padded buffer when
    slice_output=False, for consumers that fuse the slice / argmax / NLL).
    """
    B = x_nchw.shape[0]
    D = w.shape[0]
    C = w.shape[1]

    # Glue: flatten exactly like x.view(x.size(0), -1) (row-major), then cast
    # the streamed operand to bf16 (f32 accumulation happens in the kernel).
    x2d = x_nchw.reshape(B, -1).astype(jnp.bfloat16)

    # Lane-dense padding of the class dim (zero bf16 weight columns, -1e30
    # f32 bias sentinel for padded columns).
    w_pad = jnp.zeros((D, C_PAD), jnp.bfloat16).at[:, :C].set(w.astype(jnp.bfloat16))
    b_pad = jnp.full((1, C_PAD), -1e30, jnp.float32).at[0, :C].set(
        b.astype(jnp.float32)
    )

    # Batch tile: big enough to amortize per-step overhead, but capped at
    # ceil(B/2) (rounded to the sublane multiple of 8) so the parallel grid
    # axis has >= 2 steps on v7x's two TensorCores whenever B allows it.
    TB = min(tb, max(8, _round_up(pl.cdiv(B, 2), 8)))
    grid = (pl.cdiv(B, TB),)   # no jnp.pad: last block is boundary-masked

    out_padded = pl.pallas_call(
        logreg_kernel,
        out_shape=jax.ShapeDtypeStruct((B, C_PAD), jnp.float32),
        grid_spec=pltpu.PrefetchScalarGridSpec(
            num_scalar_prefetch=0,
            grid=grid,
            in_specs=[
                pl.BlockSpec((TB, D), lambda i: (i, 0)),       # x: tiled over batch
                pl.BlockSpec((D, C_PAD), lambda i: (0, 0)),    # W: resident
                pl.BlockSpec((1, C_PAD), lambda i: (0, 0)),    # b: resident
            ],
            out_specs=pl.BlockSpec((TB, C_PAD), lambda i: (i, 0)),
        ),
        compiler_params=pltpu.CompilerParams(
            # Rows are independent -> parallel axis (shards across the two
            # TensorCores on v7x; harmless on v5e/v6e).
            dimension_semantics=("parallel",),
            vmem_limit_bytes=32 * 1024 * 1024,
        ),
        cost_estimate=pl.CostEstimate(
            flops=2 * B * D * C_PAD,
            transcendentals=B * C_PAD + B,
            bytes_accessed=B * D * 2 + D * C_PAD * 2 + B * C_PAD * 4,
        ),
    )(x2d, w_pad, b_pad)

    if not slice_output:
        # Consumers must ignore columns >= C (they hold ~-1e30).
        return out_padded
    # TODO(synk): this slice is a separate XLA pass (~15% of HBM traffic);
    # fuse the downstream NLL/argmax into the kernel to drop it entirely.
    return out_padded[:, :C]


if __name__ == "__main__":
    key = jax.random.PRNGKey(0)
    k_x, k_w, k_b = jax.random.split(key, 3)

    B, D, C = 8, 28 * 28, 10

    # Deterministic synthetic "MNIST" batch, NCHW like PyTorch.
    x = jax.random.uniform(k_x, (B, 1, 28, 28), dtype=jnp.float32)
    # Script-preamble normalization (plain-JAX glue): x = (x - mean) / std
    # (torch.std is unbiased, ddof=1).
    mean = x.mean()
    std = x.std(ddof=1)
    x = (x - mean) / std

    # get_weights(*dims) = randn(dims) / dims[0]
    w = jax.random.normal(k_w, (D, C), dtype=jnp.float32) / D
    b = jax.random.normal(k_b, (C,), dtype=jnp.float32) / C

    out = logreg_forward(x, w, b)
    jax.block_until_ready(out)

    # Sanity: shape and valid log-probs.
    assert out.shape == (B, C)
    row_sums = jnp.exp(out).sum(axis=1)
    assert jnp.allclose(row_sums, jnp.ones((B,)), atol=1e-3)

    # Tight check against a reference that uses the same bf16-cast inputs
    # (isolates MXU accumulation-order differences only).
    x2d = x.reshape(B, -1)
    xb = x2d.astype(jnp.bfloat16).astype(jnp.float32)
    wb = w.astype(jnp.bfloat16).astype(jnp.float32)
    logits_b = jnp.dot(xb, wb, precision=lax.Precision.HIGHEST) + b
    ref_b = logits_b - jax.scipy.special.logsumexp(logits_b, axis=1, keepdims=True)
    assert jnp.allclose(out, ref_b, atol=1e-3, rtol=1e-3)

    # Looser semantic check against the full-f32 PyTorch formula
    # (bf16 streaming of x/W introduces ~1e-3-level differences).
    logits_f = jnp.dot(x2d, w, precision=lax.Precision.HIGHEST) + b
    ref_f = jnp.log(jnp.exp(logits_f) / jnp.exp(logits_f).sum(axis=1, keepdims=True))
    assert jnp.allclose(out, ref_f, atol=2e-2, rtol=2e-2)

    print("KERNEL_OK")
</pallas_src>

<mosaic_0001>
module attributes {stable_mosaic.version = 11 : i64} {
  func.func @logreg_kernel(%arg0: i32, %arg1: memref<8x784xbf16, #tpu.memory_space<vmem>>, %arg2: memref<784x128xbf16, #tpu.memory_space<vmem>>, %arg3: memref<1x128xf32, #tpu.memory_space<vmem>>, %arg4: memref<8x128xf32, #tpu.memory_space<vmem>>) attributes {dimension_semantics = [#tpu.dimension_semantics<parallel>], iteration_bounds = array<i64: 1>, scalar_prefetch = 0 : i64, scratch_operands = 0 : i64, tpu.core_type = #tpu.core_type<tc>, window_params = [{transform_indices = @transform_0, window_bounds = array<i64: 8, 784>}, {pipeline_mode = #tpu.pipeline_mode<synchronous>, transform_indices = @transform_1, window_bounds = array<i64: 784, 128>}, {pipeline_mode = #tpu.pipeline_mode<synchronous>, transform_indices = @transform_2, window_bounds = array<i64: 1, 128>}, {transform_indices = @transform_3, window_bounds = array<i64: 8, 128>}]} {
    %c0 = arith.constant 0 : index
    %c0_0 = arith.constant 0 : index
    %0 = vector.load %arg1[%c0, %c0_0] : memref<8x784xbf16, #tpu.memory_space<vmem>>, vector<8x784xbf16>
    %c0_1 = arith.constant 0 : index
    %c0_2 = arith.constant 0 : index
    %1 = vector.load %arg2[%c0_1, %c0_2] : memref<784x128xbf16, #tpu.memory_space<vmem>>, vector<784x128xbf16>
    %cst = arith.constant dense<0.000000e+00> : vector<8x128xf32>
    %2 = tpu.matmul %0, %1, %cst {dimension_numbers = #tpu.dot_dimension_numbers<[1], [0], [0], [1], [0, 0, 1, 1], [], []>} : vector<8x784xbf16>, vector<784x128xbf16>, vector<8x128xf32> -> vector<8x128xf32>
    %c0_3 = arith.constant 0 : index
    %c0_4 = arith.constant 0 : index
    %3 = vector.load %arg3[%c0_3, %c0_4] : memref<1x128xf32, #tpu.memory_space<vmem>>, vector<1x128xf32>
    %4 = vector.broadcast %3 : vector<1x128xf32> to vector<8x128xf32>
    %5 = arith.addf %2, %4 : vector<8x128xf32>
    %cst_5 = arith.constant dense<0xFF800000> : vector<8xf32>
    %6 = vector.multi_reduction <maximumf>, %5, %cst_5 [1] : vector<8x128xf32> to vector<8xf32>
    %7 = vector.shape_cast %6 : vector<8xf32> to vector<8x1xf32>
    %8 = vector.broadcast %7 : vector<8x1xf32> to vector<8x128xf32>
    %9 = arith.subf %5, %8 : vector<8x128xf32>
    %10 = math.exp %9 : vector<8x128xf32>
    %cst_6 = arith.constant dense<0.000000e+00> : vector<8xf32>
    %11 = vector.multi_reduction <add>, %10, %cst_6 [1] : vector<8x128xf32> to vector<8xf32>
    %12 = vector.shape_cast %11 : vector<8xf32> to vector<8x1xf32>
    %13 = math.log %12 : vector<8x1xf32>
    %14 = arith.addf %7, %13 : vector<8x1xf32>
    %15 = vector.broadcast %14 : vector<8x1xf32> to vector<8x128xf32>
    %16 = arith.subf %5, %15 : vector<8x128xf32>
    %c0_7 = arith.constant 0 : index
    %c0_8 = arith.constant 0 : index
    %17 = vector.load %arg4[%c0_7, %c0_8] : memref<8x128xf32, #tpu.memory_space<vmem>>, vector<8x128xf32>
    tpu.vector_store %arg4[%c0_7, %c0_8], %16 {strides = array<i32>} : memref<8x128xf32, #tpu.memory_space<vmem>>, vector<8x128xf32>,
    return
  }
  func.func @transform_0(%arg0: i32) -> (i32, i32) {
    %c0_i32 = arith.constant 0 : i32
    %c0_i32_0 = arith.constant 0 : i32
    return %arg0, %c0_i32 : i32, i32
  }
  func.func @transform_1(%arg0: i32) -> (i32, i32) {
    %c0_i32 = arith.constant 0 : i32
    %c0_i32_0 = arith.constant 0 : i32
    %c0_i32_1 = arith.constant 0 : i32
    return %c0_i32, %c0_i32_0 : i32, i32
  }
  func.func @transform_2(%arg0: i32) -> (i32, i32) {
    %c0_i32 = arith.constant 0 : i32
    %c0_i32_0 = arith.constant 0 : i32
    %c0_i32_1 = arith.constant 0 : i32
    return %c0_i32, %c0_i32_0 : i32, i32
  }
  func.func @transform_3(%arg0: i32) -> (i32, i32) {
    %c0_i32 = arith.constant 0 : i32
    %c0_i32_0 = arith.constant 0 : i32
    return %arg0, %c0_i32 : i32, i32
  }
}

</mosaic_0001>

<bundles_post_ra>
// kernel: tpu_custom_call.1
= control target key start
LH: loop header
LB: loop body
LE: loop exit
PB: predicated region body
PF: predicated region fallthrough
CT: control target
= control target key end

     0   :  { %8 = vsyncpa [#allocation3], 0  ;;  %s966_s0 = inlined_call_operand.hbm [shape: bf16[8,784], index: 0, kind: input, shape index: {}]   ;;  %s967_s1 = inlined_call_operand.hbm [shape: bf16[784,128], index: 1, kind: input, shape index: {}]   ;;  %s968_s2 = inlined_call_operand.vmem [shape: f32[1,128], index: 2, kind: input, shape index: {}]   ;;  %s969_s3 = inlined_call_operand.hbm [shape: f32[8,128], index: 3, kind: output, shape index: {}]  }
   0x1   :  { %9 = vsyncpa [#allocation6], 0 }
   0x2   :  { %10 = vsyncpa [#allocation4], 0  ;;  %s16_s14 = sshll.u32 %s966_s0, 4  ;;  %s929_s15 = smov [#allocation2]   ;;  %s17_s14 = int_to_ptr.hbm [resolvable:$true] %s16_s14 }
   0x3   :  { %s18_s16 = sshll.u32 %s929_s15, 4  ;;  %s26_s19 = sshll.u32 %s967_s1, 4  ;;  %s19_s16 = int_to_ptr.vmem [resolvable:$true] %s18_s16  ;;  %s27_s19 = int_to_ptr.hbm [resolvable:$true] %s26_s19 }
   0x4   :  { %21 = dma.hbm_to_vmem [thread:$0]  %s17_s14, 448, %s19_s16, [#allocation3]  }
   0x5   :  { %s930_s20 = smov [#allocation5]   ;;  %s931_s22 = smov 64  }
   0x6   :  { %s28_s21 = sshll.u32 %s930_s20, 4  ;;  %s932_s23 = smov 4   ;;  %s29_s21 = int_to_ptr.vmem [resolvable:$true] %s28_s21 }
   0x7   :  { %34 = dma.hbm_to_vmem [thread:$0]  %s27_s19, 6272, %s29_s21, [#allocation6], %s931_s22, %s931_s22, %s932_s23  }
   0x8   :  { %923 = dma.done.wait [#allocation3], 448  }
   0x9   :  { %924 = vsyncadd [#allocation3], 4294966848 }
   0xa   :  { %925 = dma.done.wait [#allocation6], 6272  }
   0xb   :  { %926 = vsyncadd [#allocation6], 4294961024  ;;  %v799_v0 = vld [vmem:[#allocation5 + $0x38] sm:$0xff]  ;;  %v798_v3 = vld [vmem:[#allocation5 + $0x30] sm:$0xff]  ;;  %vm470_vm0 = vcmask 130048   ;;  %s584_s27 = sshll.u32 %s969_s3, 4  ;;  %s585_s27 = int_to_ptr.hbm [resolvable:$true] %s584_s27 }
   0xc   :  { %v807_v1 = vld [vmem:[#allocation5 + $0x78] sm:$0xff]  ;;  %474 = vmatpush.bf16.msra.mxu0 %v799_v0  ;;  %v806_v4 = vld [vmem:[#allocation5 + $0x70] sm:$0xff]  ;;  %v797_v8 = vld [vmem:[#allocation5 + $0x28] sm:$0xff] }
   0xd   :  { %v815_v2 = vld [vmem:[#allocation5 + $0xb8] sm:$0xff]  ;;  %487 = vmatpush.bf16.msra.mxu1 %v807_v1  ;;  %v814_v5 = vld [vmem:[#allocation5 + $0xb0] sm:$0xff]  ;;  %v805_v9 = vld [vmem:[#allocation5 + $0x68] sm:$0xff] }
   0xe   :  { %500 = vmatpush.bf16.msra.mxu2 %v815_v2  ;;  %v823_v6 = vld [vmem:[#allocation5 + $0xf8] sm:$0xff]  ;;  %v822_v7 = vld [vmem:[#allocation5 + $0xf0] sm:$0xff]  ;;  %v813_v10 = vld [vmem:[#allocation5 + $0xa8] sm:$0xff] }
   0xf   :  { %513 = vmatpush.bf16.msra.mxu3 %v823_v6  ;;  %v821_v11 = vld [vmem:[#allocation5 + $0xe8] sm:$0xff]  ;;  %v796_v12 = vld [vmem:[#allocation5 + $0x20] sm:$0xff]  ;;  %v795_v16 = vld [vmem:[#allocation5 + $0x18] sm:$0xff] }
  0x10   :  { %475 = vmatpush.bf16.msra.mxu0 %v798_v3  ;;  %v804_v13 = vld [vmem:[#allocation5 + $0x60] sm:$0xff]  ;;  %v803_v17 = vld [vmem:[#allocation5 + $0x58] sm:$0xff]  ;;  %v794_v20 = vld [vmem:[#allocation5 + $0x10] sm:$0xff] }
  0x11   :  { %488 = vmatpush.bf16.msra.mxu1 %v806_v4  ;;  %v812_v14 = vld [vmem:[#allocation5 + $0xa0] sm:$0xff]  ;;  %v811_v18 = vld [vmem:[#allocation5 + $0x98] sm:$0xff]  ;;  %v802_v21 = vld [vmem:[#allocation5 + $0x50] sm:$0xff] }
  0x12   :  { %501 = vmatpush.bf16.msra.mxu2 %v814_v5  ;;  %v820_v15 = vld [vmem:[#allocation5 + $0xe0] sm:$0xff]  ;;  %v819_v19 = vld [vmem:[#allocation5 + $0xd8] sm:$0xff]  ;;  %v810_v22 = vld [vmem:[#allocation5 + $0x90] sm:$0xff] }
  0x13   :  { %514 = vmatpush.bf16.msra.mxu3 %v822_v7  ;;  %v818_v23 = vld [vmem:[#allocation5 + $0xd0] sm:$0xff]  ;;  %v793_v24 = vld [vmem:[#allocation5 + $0x8] sm:$0xff]  ;;  %v792_v32 = vld [vmem:[#allocation5] sm:$0xff] }
  0x14   :  { %476 = vmatpush.bf16.msra.mxu0 %v797_v8  ;;  %v801_v25 = vld [vmem:[#allocation5 + $0x48] sm:$0xff]  ;;  %v800_v33 = vld [vmem:[#allocation5 + $0x40] sm:$0xff]  ;;  %v831_v34 = vld [vmem:[#allocation5 + $0x138] sm:$0xff] }
  0x15   :  { %489 = vmatpush.bf16.msra.mxu1 %v805_v9  ;;  %v46_v26 = vld [vmem:[#allocation2] sm:$0xff]  ;;  %v47_v28 = vld [vmem:[#allocation2 + $0x8] sm:$0xff]  ;;  %v839_v35 = vld [vmem:[#allocation5 + $0x178] sm:$0xff] }
  0x16   :  { %502 = vmatpush.bf16.msra.mxu2 %v813_v10  ;;  %v809_v27 = vld [vmem:[#allocation5 + $0x88] sm:$0xff]  ;;  %v156_v29 = vunpack.c.l.b16 %v46_v26  ;;  %v157_v31 = vunpack.c.h.b16 %v46_v26  ;;  %v808_v36 = vld [vmem:[#allocation5 + $0x80] sm:$0xff]  ;;  %v158_v37 = vunpack.c.l.b16 %v47_v28  ;;  %v159_v40 = vunpack.c.h.b16 %v47_v28  ;;  %v830_v43 = vld [vmem:[#allocation5 + $0x130] sm:$0xff] }
  0x17   :  { %515 = vmatpush.bf16.msra.mxu3 %v821_v11  ;;  %v817_v30 = vld [vmem:[#allocation5 + $0xc8] sm:$0xff]  ;;  %v816_v41 = vld [vmem:[#allocation5 + $0xc0] sm:$0xff]  ;;  %v838_v44 = vld [vmem:[#allocation5 + $0x170] sm:$0xff] }
  0x18   :  { %477 = vmatpush.bf16.msra.mxu0 %v796_v12  ;;  %v163_v38 = vpack.c.b16 %v156_v29, %v156_v29  ;;  %v164_v39 = vpack.c.b16 %v157_v31, %v157_v31  ;;  %v840_v42 = vld [vmem:[#allocation5 + $0x180] sm:$0xff]  ;;  %v165_v45 = vpack.c.b16 %v158_v37, %v158_v37  ;;  %v166_v46 = vpack.c.b16 %v159_v40, %v159_v40  ;;  %v829_v47 = vld [vmem:[#allocation5 + $0x128] sm:$0xff]  ;;  %v49_v51 = vld [vmem:[#allocation2 + $0x18] sm:$0xf] }
  0x19   :  { %490 = vmatpush.bf16.msra.mxu1 %v804_v13  ;;  %v837_v48 = vld [vmem:[#allocation5 + $0x168] sm:$0xff]  ;;  %v828_v49 = vld [vmem:[#allocation5 + $0x120] sm:$0xff]  ;;  %v827_v52 = vld [vmem:[#allocation5 + $0x118] sm:$0xff]  ;;  %v162_v54 = vunpack.c.l.b16 %v49_v51 }
  0x1a   :  { %503 = vmatpush.bf16.msra.mxu2 %v812_v14  ;;  %v836_v50 = vld [vmem:[#allocation5 + $0x160] sm:$0xff]  ;;  %v835_v53 = vld [vmem:[#allocation5 + $0x158] sm:$0xff]  ;;  %v826_v55 = vld [vmem:[#allocation5 + $0x110] sm:$0xff] }
  0x1b   :  { %516 = vmatpush.bf16.msra.mxu3 %v820_v15  ;;  %v834_v56 = vld [vmem:[#allocation5 + $0x150] sm:$0xff]  ;;  %v169_v57 = vpack.c.b16 %v162_v54, %v162_v54  ;;  %v825_v58 = vld [vmem:[#allocation5 + $0x108] sm:$0xff]  ;;  %v824_v63 = vld [vmem:[#allocation5 + $0x100] sm:$0xff] }
  0x1c   :  { %478 = vmatpush.bf16.msra.mxu0 %v795_v16  ;;  %v833_v59 = vld [vmem:[#allocation5 + $0x148] sm:$0xff]  ;;  %v48_v60 = vld [vmem:[#allocation2 + $0x10] sm:$0xff]  ;;  %v832_v0 = vld [vmem:[#allocation5 + $0x140] sm:$0xff] }
  0x1d   :  { %491 = vmatpush.bf16.msra.mxu1 %v803_v17  ;;  %v160_v61 = vunpack.c.l.b16 %v48_v60  ;;  %v161_v62 = vunpack.c.h.b16 %v48_v60  ;;  %v846_v9 = vld [vmem:[%s968_s2] ss:$0 sm:$0xff]  ;;  %s933_s2 = smov [#allocation7]  }
  0x1e   :  { %504 = vmatpush.bf16.msra.mxu2 %v811_v18  ;;  %s582_s24 = sshll.u32 %s933_s2, 4  ;;  %s583_s24 = int_to_ptr.vmem [resolvable:$true] %s582_s24 }
  0x1f   :  { %517 = vmatpush.bf16.msra.mxu3 %v819_v19  ;;  %v167_v1 = vpack.c.b16 %v160_v61, %v160_v61  ;;  %v168_v2 = vpack.c.b16 %v161_v62, %v161_v62 }
  0x20   :  { %479 = vmatpush.bf16.msra.mxu0 %v794_v20 }
  0x21   :  { %492 = vmatpush.bf16.msra.mxu1 %v802_v21 }
  0x22   :  { %505 = vmatpush.bf16.msra.mxu2 %v810_v22 }
  0x23   :  { %518 = vmatpush.bf16.msra.mxu3 %v818_v23 }
  0x24   :  { %480 = vmatpush.bf16.msra.mxu0 %v793_v24 }
  0x25   :  { %493 = vmatpush.bf16.msra.mxu1 %v801_v25 }
  0x26   :  { %506 = vmatpush.bf16.msra.mxu2 %v809_v27 }
  0x27   :  { %519 = vmatpush.bf16.msra.mxu3 %v817_v30 }
  0x28   :  { %481 = vmatpush.bf16.msra.mxu0 %v792_v32 }
  0x29   :  { %494 = vmatpush.bf16.msra.mxu1 %v800_v33 }
  0x2a   :  { %507 = vmatpush.bf16.msra.mxu2 %v808_v36 }
  0x2b   :  { %482 = vmatmul.bf16.vlgmr.msra.gmra.mxu0 %v163_v38  ;;  %520 = vmatpush.bf16.msra.mxu3 %v816_v41 }
  0x2c   :  { %526 = vmatpush.bf16.msrb.mxu0 %v831_v34  ;;  %495 = vmatmul.bf16.vlgmr.msra.gmra.mxu1 %v164_v39 }
  0x2d   :  { %539 = vmatpush.bf16.msrb.mxu1 %v839_v35  ;;  %508 = vmatmul.bf16.vlgmr.msra.gmra.mxu2 %v165_v45 }
  0x2e   :  { %559 = vmatpush.bf16.msrb.mxu2 %v840_v42  ;;  %521 = vmatmul.bf16.vlgmr.msra.gmra.mxu3 %v166_v46 }
  0x30   :  { %527 = vmatpush.bf16.msrb.mxu0 %v830_v43 }
  0x31   :  { %540 = vmatpush.bf16.msrb.mxu1 %v838_v44 }
  0x34   :  { %528 = vmatpush.bf16.msrb.mxu0 %v829_v47 }
  0x35   :  { %541 = vmatpush.bf16.msrb.mxu1 %v837_v48 }
  0x38   :  { %529 = vmatpush.bf16.msrb.mxu0 %v828_v49 }
  0x39   :  { %542 = vmatpush.bf16.msrb.mxu1 %v836_v50 }
  0x3c   :  { %530 = vmatpush.bf16.msrb.mxu0 %v827_v52 }
  0x3d   :  { %543 = vmatpush.bf16.msrb.mxu1 %v835_v53  ;;  %791 = vmatmul.msk.bf16.vlgmr.msrb.gmra.mxu2 %vm470_vm0, %v169_v57 }
  0x40   :  { %531 = vmatpush.bf16.msrb.mxu0 %v826_v55 }
  0x41   :  { %544 = vmatpush.bf16.msrb.mxu1 %v834_v56 }
  0x44   :  { %532 = vmatpush.bf16.msrb.mxu0 %v825_v58 }
  0x45   :  { %545 = vmatpush.bf16.msrb.mxu1 %v833_v59 }
  0x48   :  { %533 = vmatpush.bf16.msrb.mxu0 %v824_v63 }
  0x49   :  { %546 = vmatpush.bf16.msrb.mxu1 %v832_v0 }
  0x4b   :  { %534 = vmatmul.bf16.vlgmr.msrb.gmra.mxu0 %v167_v1 }
  0x4c   :  { %547 = vmatmul.bf16.vlgmr.msrb.gmra.mxu1 %v168_v2 }
  0xa8   :  { %v483_v3 = vpop.f32.mrf.mxu0 }
  0xa9   :  { %v496_v4 = vpop.f32.mrf.mxu1  ;;  %v484_v10 = vadd.f32 %v846_v9, %v483_v3 }
  0xab   :  { %v497_v13 = vadd.f32 %v496_v4, %v484_v10 }
  0xb0   :  { %v485_v5 = vpop.f32.mrf.mxu0  ;;  %v509_v7 = vpop.f32.mrf.mxu2 }
  0xb1   :  { %v498_v6 = vpop.f32.mrf.mxu1  ;;  %v522_v8 = vpop.f32.mrf.mxu3  ;;  %v510_v14 = vadd.f32 %v509_v7, %v497_v13 }
  0xb3   :  { %v523_v16 = vadd.f32 %v522_v8, %v510_v14 }
  0xb8   :  { %v511_v11 = vpop.f32.mrf.mxu2 }
  0xb9   :  { %v524_v12 = vpop.f32.mrf.mxu3 }
  0xc0   :  { %v561_v15 = vpop.f32.mrf.mxu2 }
  0xc8   :  { %v535_v17 = vpop.f32.mrf.mxu0  ;;  %v563_v21 = vpop.f32.mrf.mxu2 }
  0xc9   :  { %v548_v18 = vpop.f32.mrf.mxu1  ;;  %v536_v19 = vadd.f32 %v535_v17, %v523_v16 }
  0xcb   :  { %v549_v20 = vadd.f32 %v548_v18, %v536_v19 }
  0xcd   :  { %v562_v22 = vadd.f32 %v561_v15, %v549_v20 }
  0xcf   :  { %565 = vmax.xlane.f32.xlu0 %v562_v22 }
  0xd0   :  { %v537_v23 = vpop.f32.mrf.mxu0 }
  0xd1   :  { %v550_v24 = vpop.f32.mrf.mxu1 }
 0x142   :  { %v566_v25 = vpop.xlane.xlu0 %565 }
 0x143   :  { %v567_v26 = vsub.f32 %v562_v22, %v566_v25 }
 0x145   :  { %v568_v27 = vmul.f32 1.442695, %v567_v26 }
 0x147   :  { %847 = vpow2.f32 %v568_v27 }
 0x14d   :  { %v848_v28 = vpop.eup %847 }
 0x14e   :  { %570 = vadd.xlane.f32.xlu0 %v848_v28 }
 0x1c1   :  { %v571_v29 = vpop.xlane.xlu0 %570 }
 0x1c2   :  { %849 = vlog2.f32 %v571_v29 }
 0x1c8   :  { %v850_v30 = vpop.eup %849 }
 0x1c9   :  { %v573_v31 = vmul.f32 0.6931472, %v850_v30 }
 0x1cb   :  { %v574_v32 = vadd.f32 %v573_v31, %v566_v25 }
 0x1cd   :  { %v575_v33 = vsub.f32 %v562_v22, %v574_v32 }
 0x1cf   :  { %576 = vst [vmem:[#allocation7] sm:$0xff] %v575_v33 }
 0x1d0   :  { %587 = dma.vmem_to_hbm [thread:$0]  %s583_s24, 128, %s585_s27, [#allocation4]  }
 0x1d1   :  { %927 = dma.done.wait [#allocation4], 128  }
 0x1d2   :  { %928 = vsyncadd [#allocation4], 4294967168 }
 0x1d3   :  { %592 = vsyncpa [#allocation3], 1 }
 0x1d4   :  { %593 = vsyncpa [#allocation6], 1 }
 0x1d5   :  { %594 = vsyncpa [#allocation4], 1 }

</bundles_post_ra>
